<compile_context>
chip_gen: v7x
topology: tpu7x:2x2x1
jax: 0.10.0
libtpu: 0.0.40
codegen_flags: <defaults>
</compile_context>

<pallas_src>
import functools

import jax
import jax.numpy as jnp
from jax.experimental import pallas as pl
from jax.experimental.pallas import tpu as pltpu


def _focal_loss_kernel(logits_ref, target_ref, alpha_ref, out_ref, *,
                       gamma, hw, t_lane, needs_mask):
    x = logits_ref[...].astype(jnp.float32)            # (1, C, T)
    tgt = target_ref[...]                               # (1, 1, T) int32
    _, c, tl = x.shape

    # log_softmax over the class (sublane) axis, numerically stable.
    m = jnp.max(x, axis=1, keepdims=True)                # (1, 1, T)
    lse = m + jnp.log(jnp.sum(jnp.exp(x - m), axis=1, keepdims=True))
    logsm = x - lse                                       # (1, C, T)

    # Gather log p_t and alpha_t at the target class via one-hot select.
    cls = jax.lax.broadcasted_iota(jnp.int32, (1, c, tl), 1)
    onehot = cls == tgt                                   # (1, C, T) bool
    logpt = jnp.sum(jnp.where(onehot, logsm, 0.0), axis=1, keepdims=True)  # (1,1,T)
    pt = jnp.exp(logpt)

    alpha = alpha_ref[...].astype(jnp.float32)            # (1, C, 1)
    at = jnp.sum(jnp.where(onehot, alpha, 0.0), axis=1, keepdims=True)      # (1,1,T)
    logpt = logpt * at

    # (1 - pt) ** gamma : special-case integer gamma with plain multiplies.
    u = 1.0 - pt
    g = float(gamma)
    if g == 0.0:
        focal = jnp.ones_like(u)
    elif g == round(g) and 1 <= int(round(g)) <= 8:
        focal = u
        for _ in range(int(round(g)) - 1):
            focal = focal * u
    else:
        focal = u ** g

    loss = -1.0 * focal * logpt                           # (1, 1, T)

    # Mask spatial columns past HW (ragged tail of the last block).
    if needs_mask:
        col = (jax.lax.broadcasted_iota(jnp.int32, (1, 1, tl), 2)
               + pl.program_id(1) * t_lane)
        loss = jnp.where(col < hw, loss, 0.0)

    # Per-block partial sum, written lane-aligned (lane 0 holds the value).
    partial = jnp.sum(loss)
    lane = jax.lax.broadcasted_iota(jnp.int32, (1, 1, 128), 2)
    out_ref[...] = jnp.where(lane == 0, partial, 0.0)


def focal_loss(logits_nchw, target_nhw, *, gamma=0.0, alpha=None,
               size_average=True, t_lanes=2048):
    """Pallas TPU focal loss matching FocalLoss.forward semantics (NCHW input)."""
    n, c, h, w = logits_nchw.shape
    hw = h * w

    # Pure reshapes — no transpose, no pad, no dtype copy of the big input.
    x = logits_nchw.reshape(n, c, hw)
    tgt = target_nhw.reshape(n, 1, hw).astype(jnp.int32)

    # alpha handling mirrors FocalLoss.__init__.
    if alpha is None:
        alpha_arr = jnp.ones((c,), jnp.float32)           # at == 1 -> no effect
    elif isinstance(alpha, (float, int)):
        alpha_arr = jnp.array([alpha, 1.0 - alpha], jnp.float32)
    else:
        alpha_arr = jnp.asarray(alpha, jnp.float32).reshape(-1)
    if alpha_arr.shape[0] != c:
        # The PyTorch module would also fail its gather here unless C matches.
        raise ValueError(
            f"alpha has {alpha_arr.shape[0]} entries but input has {c} classes")
    alpha_arr = alpha_arr.reshape(1, c, 1)

    # Spatial lane tile: full HW if it fits, else a multiple of 128 with a
    # masked ragged tail (no host-side padding of the input).
    assert t_lanes % 128 == 0
    t_lane = hw if hw <= t_lanes else t_lanes
    num_t = -(-hw // t_lane)
    needs_mask = (num_t * t_lane) != hw
    grid = (n, num_t)

    kernel = functools.partial(_focal_loss_kernel, gamma=float(gamma),
                               hw=hw, t_lane=t_lane, needs_mask=needs_mask)

    partials = pl.pallas_call(
        kernel,
        out_shape=jax.ShapeDtypeStruct((n * num_t, 1, 128), jnp.float32),
        grid_spec=pltpu.PrefetchScalarGridSpec(
            num_scalar_prefetch=0,
            grid=grid,
            in_specs=[
                pl.BlockSpec((1, c, t_lane), lambda ni, ti: (ni, 0, ti)),  # logits
                pl.BlockSpec((1, 1, t_lane), lambda ni, ti: (ni, 0, ti)),  # targets
                pl.BlockSpec((1, c, 1), lambda ni, ti: (0, 0, 0)),          # alpha (resident)
            ],
            out_specs=pl.BlockSpec((1, 1, 128),
                                   lambda ni, ti: (ni * num_t + ti, 0, 0)),
        ),
        compiler_params=pltpu.CompilerParams(
            dimension_semantics=("parallel", "parallel")),
    )(x, tgt, alpha_arr)

    total = jnp.sum(partials)
    if size_average:
        total = total / jnp.float32(n * hw)
    return total


def _focal_loss_ref(logits_nchw, target_nhw, *, gamma, alpha, size_average):
    n, c, h, w = logits_nchw.shape
    x = jnp.transpose(logits_nchw, (0, 2, 3, 1)).reshape(-1, c).astype(jnp.float32)
    t = target_nhw.reshape(-1).astype(jnp.int32)
    logsm = jax.nn.log_softmax(x, axis=1)
    logpt = jnp.take_along_axis(logsm, t[:, None], axis=1)[:, 0]
    pt = jnp.exp(logpt)
    if alpha is not None:
        a = jnp.asarray(alpha, jnp.float32)
        logpt = logpt * a[t]
    loss = -1.0 * (1.0 - pt) ** gamma * logpt
    return jnp.mean(loss) if size_average else jnp.sum(loss)


if __name__ == "__main__":
    key = jax.random.PRNGKey(0)
    k1, k2, k3, k4 = jax.random.split(key, 4)

    # Test 1: per-class alpha list, gamma=2 (integer fast path), mean reduction.
    N, C, H, W = 2, 4, 16, 16
    logits = jax.random.normal(k1, (N, C, H, W), dtype=jnp.float32)
    target = jax.random.randint(k2, (N, H, W), 0, C, dtype=jnp.int32)
    gamma, alpha = 2.0, [0.1, 0.2, 0.3, 0.4]
    loss = focal_loss(logits, target, gamma=gamma, alpha=alpha, size_average=True)
    loss = jax.block_until_ready(loss)
    ref = _focal_loss_ref(logits, target, gamma=gamma, alpha=alpha,
                          size_average=True)
    assert jnp.allclose(loss, ref, rtol=1e-4, atol=1e-5), (loss, ref)

    # Test 2: ragged spatial tail (HW not a multiple of the lane tile),
    # alpha=None, non-integer gamma, sum reduction.
    N2, C2, H2, W2 = 2, 3, 15, 20
    logits2 = jax.random.normal(k3, (N2, C2, H2, W2), dtype=jnp.float32)
    target2 = jax.random.randint(k4, (N2, H2, W2), 0, C2, dtype=jnp.int32)
    loss2 = focal_loss(logits2, target2, gamma=1.5, alpha=None,
                       size_average=False, t_lanes=128)
    loss2 = jax.block_until_ready(loss2)
    ref2 = _focal_loss_ref(logits2, target2, gamma=1.5, alpha=None,
                           size_average=False)
    assert jnp.allclose(loss2, ref2, rtol=1e-4, atol=1e-4), (loss2, ref2)

    print("KERNEL_OK")
</pallas_src>

<mosaic_0001>
module attributes {stable_mosaic.version = 11 : i64} {
  func.func @_focal_loss_kernel(%arg0: i32, %arg1: i32, %arg2: memref<1x4x256xf32, #tpu.memory_space<vmem>>, %arg3: memref<1x1x256xi32, #tpu.memory_space<vmem>>, %arg4: memref<1x4x1xf32, #tpu.memory_space<vmem>>, %arg5: memref<1x1x128xf32, #tpu.memory_space<vmem>>) attributes {dimension_semantics = [#tpu.dimension_semantics<parallel>, #tpu.dimension_semantics<parallel>], iteration_bounds = array<i64: 2, 1>, scalar_prefetch = 0 : i64, scratch_operands = 0 : i64, tpu.core_type = #tpu.core_type<tc>, window_params = [{transform_indices = @transform_0, window_bounds = array<i64: 1, 4, 256>}, {transform_indices = @transform_1, window_bounds = array<i64: 1, 1, 256>}, {pipeline_mode = #tpu.pipeline_mode<synchronous>, transform_indices = @transform_2, window_bounds = array<i64: 1, 4, 1>}, {transform_indices = @transform_3, window_bounds = array<i64: 1, 1, 128>}]} {
    %c0 = arith.constant 0 : index
    %c0_0 = arith.constant 0 : index
    %c0_1 = arith.constant 0 : index
    %0 = vector.load %arg2[%c0, %c0_0, %c0_1] : memref<1x4x256xf32, #tpu.memory_space<vmem>>, vector<1x4x256xf32>
    %c0_2 = arith.constant 0 : index
    %c0_3 = arith.constant 0 : index
    %c0_4 = arith.constant 0 : index
    %1 = vector.load %arg3[%c0_2, %c0_3, %c0_4] : memref<1x1x256xi32, #tpu.memory_space<vmem>>, vector<1x1x256xi32>
    %cst = arith.constant dense<0xFF800000> : vector<1x256xf32>
    %2 = vector.multi_reduction <maximumf>, %0, %cst [1] : vector<1x4x256xf32> to vector<1x256xf32>
    %3 = vector.shape_cast %2 : vector<1x256xf32> to vector<1x1x256xf32>
    %4 = vector.broadcast %3 : vector<1x1x256xf32> to vector<1x4x256xf32>
    %5 = arith.subf %0, %4 : vector<1x4x256xf32>
    %6 = math.exp %5 : vector<1x4x256xf32>
    %cst_5 = arith.constant dense<0.000000e+00> : vector<1x256xf32>
    %7 = vector.multi_reduction <add>, %6, %cst_5 [1] : vector<1x4x256xf32> to vector<1x256xf32>
    %8 = vector.shape_cast %7 : vector<1x256xf32> to vector<1x1x256xf32>
    %9 = math.log %8 : vector<1x1x256xf32>
    %10 = arith.addf %3, %9 : vector<1x1x256xf32>
    %11 = vector.broadcast %10 : vector<1x1x256xf32> to vector<1x4x256xf32>
    %12 = arith.subf %0, %11 : vector<1x4x256xf32>
    %13 = tpu.iota {dimensions = array<i32: 1>} : vector<1x4x256xi32>
    %14 = vector.broadcast %1 : vector<1x1x256xi32> to vector<1x4x256xi32>
    %15 = arith.cmpi eq, %13, %14 : vector<1x4x256xi32>
    %cst_6 = arith.constant 0.000000e+00 : f32
    %16 = vector.broadcast %cst_6 : f32 to vector<1x4x256xf32>
    %17 = arith.select %15, %12, %16 : vector<1x4x256xi1>, vector<1x4x256xf32>
    %cst_7 = arith.constant dense<0.000000e+00> : vector<1x256xf32>
    %18 = vector.multi_reduction <add>, %17, %cst_7 [1] : vector<1x4x256xf32> to vector<1x256xf32>
    %19 = vector.shape_cast %18 : vector<1x256xf32> to vector<1x1x256xf32>
    %20 = math.exp %19 : vector<1x1x256xf32>
    %c0_8 = arith.constant 0 : index
    %c0_9 = arith.constant 0 : index
    %c0_10 = arith.constant 0 : index
    %21 = vector.load %arg4[%c0_8, %c0_9, %c0_10] : memref<1x4x1xf32, #tpu.memory_space<vmem>>, vector<1x4x1xf32>
    %cst_11 = arith.constant 0.000000e+00 : f32
    %22 = vector.shape_cast %21 : vector<1x4x1xf32> to vector<1x4x1xf32>
    %23 = vector.broadcast %22 : vector<1x4x1xf32> to vector<1x4x256xf32>
    %24 = vector.broadcast %cst_11 : f32 to vector<1x4x256xf32>
    %25 = arith.select %15, %23, %24 : vector<1x4x256xi1>, vector<1x4x256xf32>
    %cst_12 = arith.constant dense<0.000000e+00> : vector<1x256xf32>
    %26 = vector.multi_reduction <add>, %25, %cst_12 [1] : vector<1x4x256xf32> to vector<1x256xf32>
    %27 = vector.shape_cast %26 : vector<1x256xf32> to vector<1x1x256xf32>
    %28 = arith.mulf %19, %27 : vector<1x1x256xf32>
    %cst_13 = arith.constant 1.000000e+00 : f32
    %29 = vector.broadcast %cst_13 : f32 to vector<1x1x256xf32>
    %30 = arith.subf %29, %20 : vector<1x1x256xf32>
    %31 = arith.mulf %30, %30 : vector<1x1x256xf32>
    %cst_14 = arith.constant -1.000000e+00 : f32
    %32 = vector.broadcast %cst_14 : f32 to vector<1x1x256xf32>
    %33 = arith.mulf %32, %31 : vector<1x1x256xf32>
    %34 = arith.mulf %33, %28 : vector<1x1x256xf32>
    %35 = vector.shape_cast %34 : vector<1x1x256xf32> to vector<1x1x1x256xf32>
    %cst_15 = arith.constant dense<0.000000e+00> : vector<1xf32>
    %36 = vector.multi_reduction <add>, %35, %cst_15 [1, 2, 3] : vector<1x1x1x256xf32> to vector<1xf32>
    %37 = vector.shape_cast %36 : vector<1xf32> to vector<1x1x1x1xf32>
    %38 = vector.extract %37[0, 0, 0, 0] : f32 from vector<1x1x1x1xf32>
    %39 = tpu.iota {dimensions = array<i32: 2>} : vector<1x1x128xi32>
    %c0_i32 = arith.constant 0 : i32
    %40 = vector.broadcast %c0_i32 : i32 to vector<1x1x128xi32>
    %41 = arith.cmpi eq, %39, %40 : vector<1x1x128xi32>
    %cst_16 = arith.constant 0.000000e+00 : f32
    %42 = vector.broadcast %38 : f32 to vector<1x1x128xf32>
    %43 = vector.broadcast %cst_16 : f32 to vector<1x1x128xf32>
    %44 = arith.select %41, %42, %43 : vector<1x1x128xi1>, vector<1x1x128xf32>
    %c0_17 = arith.constant 0 : index
    %c0_18 = arith.constant 0 : index
    %c0_19 = arith.constant 0 : index
    %45 = vector.load %arg5[%c0_17, %c0_18, %c0_19] : memref<1x1x128xf32, #tpu.memory_space<vmem>>, vector<1x1x128xf32>
    tpu.vector_store %arg5[%c0_17, %c0_18, %c0_19], %44 {strides = array<i32>} : memref<1x1x128xf32, #tpu.memory_space<vmem>>, vector<1x1x128xf32>,
    return
  }
  func.func @transform_0(%arg0: i32, %arg1: i32) -> (i32, i32, i32) {
    %c0_i32 = arith.constant 0 : i32
    %c0_i32_0 = arith.constant 0 : i32
    return %arg0, %c0_i32, %arg1 : i32, i32, i32
  }
  func.func @transform_1(%arg0: i32, %arg1: i32) -> (i32, i32, i32) {
    %c0_i32 = arith.constant 0 : i32
    %c0_i32_0 = arith.constant 0 : i32
    return %arg0, %c0_i32, %arg1 : i32, i32, i32
  }
  func.func @transform_2(%arg0: i32, %arg1: i32) -> (i32, i32, i32) {
    %c0_i32 = arith.constant 0 : i32
    %c0_i32_0 = arith.constant 0 : i32
    %c0_i32_1 = arith.constant 0 : i32
    %c0_i32_2 = arith.constant 0 : i32
    return %c0_i32, %c0_i32_0, %c0_i32_1 : i32, i32, i32
  }
  func.func @transform_3(%arg0: i32, %arg1: i32) -> (i32, i32, i32) {
    %c1_i32 = arith.constant 1 : i32
    %0 = arith.muli %arg0, %c1_i32 : i32
    %1 = arith.addi %0, %arg1 : i32
    %c0_i32 = arith.constant 0 : i32
    %c0_i32_0 = arith.constant 0 : i32
    %c0_i32_1 = arith.constant 0 : i32
    return %1, %c0_i32, %c0_i32_0 : i32, i32, i32
  }
}

</mosaic_0001>

<bundles_post_ra>
// kernel: tpu_custom_call.1
= control target key start
LH: loop header
LB: loop body
LE: loop exit
PB: predicated region body
PF: predicated region fallthrough
CT: control target
= control target key end

     0   :  { %8 = vsyncpa [#allocation3], 0  ;;  %s910_s0 = inlined_call_operand.hbm [shape: f32[2,4,256], index: 0, kind: input, shape index: {}]   ;;  %s911_s1 = inlined_call_operand.vmem [shape: s32[2,1,256], index: 1, kind: input, shape index: {}]   ;;  %s912_s2 = inlined_call_operand.vmem [shape: f32[1,4,1], index: 2, kind: input, shape index: {}]   ;;  %s913_s3 = inlined_call_operand.hbm [shape: f32[2,1,128], index: 3, kind: output, shape index: {}]  }
   0x1   :  { %10 = vsyncpa [#allocation3 + $0x1], 0 }
   0x2   :  { %11 = vsyncpa [#allocation4], 0 }
   0x3   :  { %13 = vsyncpa [#allocation4 + $0x1], 0  ;;  %s715_s12 = smov 0   ;;  %s717_s13 = smov 0  }
   0x4   :  { %s719_s14 = smov 0   ;;  %s721_s15 = smov 0  }
   0x5   :  { %s723_s16 = smov 0   ;;  %s725_s17 = smov 0  }
   0x6 LB: > { %s487_s18 = sadd.s32 4294967295, %s690_s17   ;;  %s488_s19 = sadd.s32 4294967294, %s690_s17   ;;  %s690_s17 = sphi %s725_s17, %s19_s17   ;;  %s686_s16 = sphi %s723_s16, %s929_s16   ;;  %s682_s15 = sphi %s721_s15, %s928_s15   ;;  %s678_s14 = sphi %s719_s14, %s927_s14   ;;  %s674_s13 = sphi %s717_s13, %s926_s13   ;;  %s670_s12 = sphi %s715_s12, %s925_s12  }
   0x7   : > { %s31_s20 = sadd.s32 1, %s686_s16  ;;  %s40_s21 = sadd.s32 1, %s678_s14 }
   0x8   : > { %p33_p0 = scmp.ge.s32.totalorder %s31_s20, 2  ;;  %p47_p1 = scmp.ne.s32.totalorder %s678_s14, %s674_s13 }
   0x9   : > { %p48_p2 = scmp.eq.s32.totalorder %s690_s17, 0  ;;  %p53_p3 = scmp.ne.s32.totalorder %s674_s13, %s670_s12 }
   0xa   : > { %s931_s20 = smov (%p33_p0, %s31_s20), 0  ;;  %p54_p5 = scmp.eq.s32.totalorder %s487_s18, 0 }
   0xb   : > { %p756_p4 = por %p48_p2, %p47_p1  ;;  %s35_s23 = ssub.s32 %s686_s16, %s931_s20 }
   0xc   : > { %p128_p6 = scmp.eq.s32.totalorder %s487_s18, 1  ;;  %p38_p7 = scmp.eq.s32.totalorder %s35_s23, 0 }
   0xd   : > { %p762_p8 = por %p54_p5, %p53_p3  ;;  %p134_p10 = scmp.eq.s32.totalorder %s488_s19, 1 }
   0xe   : > { %p766_p9 = por %p128_p6, %p47_p1  ;;  %p515_p13 = scmp.lt.s32.totalorder %s690_s17, 2 }
   0xf   : > { %s771_s26 = scalar_select %p38_p7, %s678_s14, %s40_s21  }
  0x10   : > { %s917_s25 = scalar_select %p766_p9, 1, 0 }
  0x11   : > { %p773_p11 = por %p134_p10, %p53_p3  ;;  %s157_s28 = sand.u32 1, %s678_s14  }
  0x12   : > { %s491_s29 = sshll.u32 %s157_s28, 3  ;;  %s500_s30 = sshll.u32 %s686_s16, 7 }
  0x13   : > { %s918_s27 = scalar_select %p773_p11, 1, 0 }
  0x14   : > { %s784_s6 = scalar_lea.hbm %s910_s0, %s500_s30  ;;  %s161_s7 = scalar_lea.vmem [#allocation2], %s491_s29 }
  0x15   : > { %s171_s8 = sshll.u32 %s161_s7, 4  ;;  %p790_p0 = pnand %p515_p13, %p756_p4  ;;  %s786_s8 = int_to_ptr.vmem [resolvable:$true] %s171_s8 }
  0x16   : > { %s158_s10 = scalar_lea.sflag [#allocation3], %s157_s28  ;;  %s578_s11 = scalar_lea.hbm %s784_s6, 128 }
  0x17   : > { %p579_p3 = scmp.ne.s32.totalorder %s784_s6, %s578_s11  ;;  %p580_p5 = pneg %p790_p0 }
  0x18   : > { %s583_s21 = scalar_lea.hbm %s910_s0, 256  ;;  %p584_p4 = scmp.lt.u32.totalorder %s784_s6, %s910_s0 }
  0x19   : > { %p581_p6 = pnand %p580_p5, %p579_p3  ;;  %p585_p10 = scmp.lt.u32.totalorder %s583_s21, %s578_s11 }
  0x1a   : > { %p587_p12 = scmp.lt.u32.totalorder %s578_s11, %s784_s6 }
  0x1b   : > { %p582_p7 = pneg %p581_p6  ;;  %p586_p13 = por %p585_p10, %p584_p4 }
  0x1d   : > { %p588_p1 = por %p587_p12, %p586_p13 }
  0x1f   : > { %p589_p2 = pnand %p588_p1, %p582_p7 }
  0x21   : > { %592 = shalt.err (!%p589_p2)
}
  0x22   : > { %s593_s28 = scalar_lea.vmem %s786_s8, 128  ;;  %s692_s29 = smov [#allocation2]  }
  0x23   : > { %p594_p3 = scmp.ne.s32.totalorder %s786_s8, %s593_s28  ;;  %s598_s30 = sshll.u32 %s692_s29, 4  ;;  %s599_s30 = int_to_ptr.vmem [resolvable:$false] %s598_s30 }
  0x24   : > { %s600_s4 = scalar_lea.vmem %s599_s30, 256  ;;  %p601_p9 = scmp.lt.s32.totalorder %s786_s8, %s599_s30 }
  0x25   : > { %p596_p6 = pnand %p594_p3, %p580_p5  ;;  %p602_p4 = scmp.lt.s32.totalorder %s600_s4, %s593_s28 }
  0x27   : > { %p597_p11 = pneg %p596_p6  ;;  %p603_p10 = por %p602_p4, %p601_p9 }
  0x29   : > { %p604_p12 = pnand %p603_p10, %p597_p11 }
  0x2b   : > { %607 = shalt.err (!%p604_p12)
}
  0x2c   : > { %510 = dma.hbm_to_vmem [thread:$0]  (!%p790_p0), %s784_s6, 128, %s786_s8, %s158_s10  }
  0x2d   : > { %p920_p1 = scmp.lt.s32.totalorder %s690_s17, 3  ;;  %p921_p2 = scmp.ge.s32.totalorder %s690_s17, 1 }
  0x2f   : > { %p189_p5 = pnand %p921_p2, %p920_p1 }
  0x30   : > { %s826_s5 = sand.u32 (!%p189_p5), 1, %s674_s13  }
  0x31   : > { %192 = sbr.rel (%p189_p5) target bundleno = 428 (0x1ac), region = 32  ;;  %s495_s7 = sshll.u32 (!%p189_p5), %s826_s5, 3 }
  0x32   : > { %s195_s11 = scalar_lea.sflag (!%p189_p5), [#allocation3], %s826_s5  ;;  %s198_s18 = scalar_lea.vmem (!%p189_p5), [#allocation2], %s495_s7 }
  0x38   : > { %661 = dma.done.wait (%p762_p8), %s195_s11, 128  }
  0x39   : > { %663 = vsyncadd (%p762_p8), %s195_s11, 4294967168  ;;  %v693_v0 = vmov 0   ;;  %vm244_vm0 = vcmask 1043456   ;;  %v329_v1 = vld [vmem:[%s912_s2] sm:$0xf]  ;;  %p230_p8 = scmp.lt.s32.totalorder %s682_s15, 1  ;;  %v294_v39 = vlaneseq }
  0x3a   : > { %566 = vset.pattern.permute.xlu0 %v693_v0  ;;  %v239_v2 = vld [vmem:[%s198_s18] sm:$0xff]  ;;  %vm361_vm3 = vcmask 1040384   ;;  %s497_s22 = sshll.u32 %s682_s15, 4  ;;  %s227_s23 = scalar_lea.vmem [#allocation5], %s826_s5 }
  0x3b   : > { %332 = vperm.xlu0 %566, %v329_v1   ;;  %v242_v3 = vcombine.high %v239_v2, %v239_v2  ;;  %v245_v4 = vsel %vm244_vm0, %v239_v2, -inf  ;;  %s231_s24 = scalar_select %p230_p8, %s682_s15, 1  ;;  %v295_v42 = vshrl.u32 %v294_v39, 7 }
  0x3c   : > { %v246_v5 = vrot.slane %v245_v4, 4  ;;  %s394_s28 = sshll.u32 %s227_s23, 4  ;;  %s861_s7 = scalar_lea.hbm %s913_s3, %s497_s22  ;;  %s863_s28 = int_to_ptr.vmem [resolvable:$true] %s394_s28 }
  0x3d   : > { %v252_v6 = vsel %vm244_vm0, %v242_v3, -inf  ;;  %s496_s9 = sshll.u32 %s231_s24, 1  ;;  %v298_v45 = vsub.s32 0, %v295_v42  ;;  %v302_v47 = vsub.s32 1, %v295_v42  ;;  %s381_s11 = scalar_lea.sflag [#allocation4], %s826_s5 }
  0x3e   : > { %v247_v7 = vmax.f32 %v245_v4, %v246_v5  ;;  %v253_v8 = vrot.slane %v252_v6, 4  ;;  %s236_s21 = scalar_lea.vmem %s911_s1, %s496_s9  ;;  %s608_s18 = scalar_lea.vmem %s863_s28, 16 }
  0x3f   : > { %v240_v48 = vld [vmem:[%s236_s21] sm:$0x3]  ;;  %p609_p9 = scmp.ne.s32.totalorder %s863_s28, %s608_s18  ;;  %p922_p11 = scmp.ne.s32.totalorder %s917_s25, 0 }
  0x40   : > { %v248_v9 = vrot.slane %v247_v7, 2  ;;  %v254_v10 = vmax.f32 %v252_v6, %v253_v8  ;;  %v299_v50 = vrot.slane %v240_v48, %v298_v45  ;;  %v303_v51 = vrot.slane %v240_v48, %v302_v47  ;;  %s694_s15 = smov [#allocation5]  }
  0x41   : > { %v375_v47 = vand.u32 127, %v294_v39  ;;  %p610_p0 = pnand %p609_p9, %p922_p11  ;;  %s612_s6 = sshll.u32 %s694_s15, 4  ;;  %s613_s6 = int_to_ptr.vmem [resolvable:$false] %s612_s6 }
  0x42   : > { %v249_v11 = vmax.f32 %v247_v7, %v248_v9  ;;  %v255_v12 = vrot.slane %v254_v10, 2  ;;  %vm304_vm1 = vcmp.eq.s32.totalorder %v295_v42, %v299_v50  ;;  %vm305_vm2 = vcmp.eq.s32.totalorder %v295_v42, %v303_v51  ;;  %s614_s8 = scalar_lea.vmem %s613_s6, 32  ;;  %p615_p13 = scmp.lt.s32.totalorder %s863_s28, %s613_s6 }
  0x43   : > { %vm376_vm4 = vcmp.eq.s32.totalorder %v375_v47, 0  ;;  %p611_p7 = pneg %p610_p0  ;;  %p616_p3 = scmp.lt.s32.totalorder %s614_s8, %s608_s18 }
  0x44   : > { %v250_v13 = vrot.slane %v249_v11, 1  ;;  %v256_v14 = vmax.f32 %v254_v10, %v255_v12 }
  0x45   : > { %p617_p6 = por %p616_p3, %p615_p13 }
  0x46   : > { %v251_v15 = vmax.f32 %v249_v11, %v250_v13  ;;  %v257_v16 = vrot.slane %v256_v14, 1 }
  0x47   : > { %p618_p4 = pnand %p617_p6, %p611_p7 }
  0x48   : > { %v258_v17 = vmax.f32 %v256_v14, %v257_v16 }
  0x4a   : > { %v261_v18 = vcombine.low %v251_v15, %v258_v17 }
  0x4c   : > { %v263_v19 = vsub.f32 %v239_v2, %v261_v18 }
  0x4e   : > { %v264_v20 = vmul.f32 1.442695, %v263_v19 }
  0x50   : > { %568 = vpow2.f32 %v264_v20 }
  0x5a   : > { %v569_v21 = vpop.eup %568 }
  0x5b   : > { %v267_v22 = vcombine.high %v569_v21, %v569_v21  ;;  %v269_v23 = vsel %vm244_vm0, %v569_v21, 0.0 }
  0x5c   : > { %v270_v24 = vrot.slane %v269_v23, 4 }
  0x5d   : > { %v276_v25 = vsel %vm244_vm0, %v267_v22, 0.0 }
  0x5e   : > { %v271_v26 = vadd.f32 %v270_v24, %v269_v23  ;;  %v277_v27 = vrot.slane %v276_v25, 4 }
  0x60   : > { %v272_v28 = vrot.slane %v271_v26, 2  ;;  %v278_v29 = vadd.f32 %v277_v27, %v276_v25 }
  0x62   : > { %v273_v30 = vadd.f32 %v272_v28, %v271_v26  ;;  %v279_v31 = vrot.slane %v278_v29, 2 }
  0x64   : > { %v280_v32 = vadd.f32 %v279_v31, %v278_v29  ;;  %v274_v33 = vrot.slane %v273_v30, 1 }
  0x66   : > { %v281_v34 = vrot.slane %v280_v32, 1  ;;  %v275_v35 = vadd.f32 %v274_v33, %v273_v30 }
  0x68   : > { %v282_v36 = vadd.f32 %v281_v34, %v280_v32  ;;  %570 = vlog2.f32 %v275_v35 }
  0x6a   : > { %572 = vlog2.f32 %v282_v36 }
  0x72   : > { %v571_v37 = vpop.eup %570 }
  0x73   : > { %v284_v40 = vmul.f32 0.6931472, %v571_v37 }
  0x74   : > { %v573_v38 = vpop.eup %572 }
  0x75   : > { %v286_v41 = vmul.f32 0.6931472, %v573_v38  ;;  %v287_v43 = vadd.f32 %v284_v40, %v251_v15 }
  0x77   : > { %v288_v44 = vadd.f32 %v286_v41, %v258_v17 }
  0x79   : > { %v291_v46 = vcombine.low %v287_v43, %v288_v44 }
  0x7b   : > { %v293_v49 = vsub.f32 %v239_v2, %v291_v46 }
  0x7d   : > { %v307_v52 = vcombine.high %v293_v49, %v293_v49  ;;  %v309_v53 = vsel %vm304_vm1, %v293_v49, 0.0 }
  0x7e   : > { %v311_v55 = vsel %vm244_vm0, %v309_v53, 0.0 }
  0x7f   : > { %v310_v54 = vsel %vm305_vm2, %v307_v52, 0.0  ;;  %v312_v57 = vrot.slane %v311_v55, 4 }
  0x80   : > { %v318_v56 = vsel %vm244_vm0, %v310_v54, 0.0 }
  0x81   : > { %v319_v58 = vrot.slane %v318_v56, 4  ;;  %v313_v59 = vadd.f32 %v312_v57, %v311_v55 }
  0x83   : > { %v320_v60 = vadd.f32 %v319_v58, %v318_v56  ;;  %v314_v61 = vrot.slane %v313_v59, 2 }
  0x85   : > { %v321_v62 = vrot.slane %v320_v60, 2  ;;  %v315_v63 = vadd.f32 %v314_v61, %v313_v59 }
  0x87   : > { %v322_v0 = vadd.f32 %v321_v62, %v320_v60  ;;  %v316_v1 = vrot.slane %v315_v63, 1 }
  0x89   : > { %v323_v2 = vrot.slane %v322_v0, 1  ;;  %v317_v3 = vadd.f32 %v316_v1, %v315_v63 }
  0x8b   : > { %v324_v4 = vadd.f32 %v323_v2, %v322_v0  ;;  %v325_v5 = vmul.f32 1.442695, %v317_v3 }
  0x8d   : > { %v327_v6 = vmul.f32 1.442695, %v324_v4  ;;  %574 = vpow2.f32 %v325_v5 }
  0x8f   : > { %576 = vpow2.f32 %v327_v6 }
  0x97   : > { %v575_v8 = vpop.eup %574 }
  0x98   : > { %v353_v18 = vsub.f32 1.0, %v575_v8 }
  0x99   : > { %v577_v11 = vpop.eup %576 }
  0x9a   : > { %v354_v19 = vsub.f32 1.0, %v577_v11  ;;  %v355_v24 = vmul.f32 %v353_v18, %v353_v18 }
  0x9c   : > { %v356_v25 = vmul.f32 %v354_v19, %v354_v19  ;;  %v357_v30 = vmul.f32 -1.0, %v355_v24 }
  0x9e   : > { %v358_v31 = vmul.f32 -1.0, %v356_v25 }
  0xba   : > { %v333_v7 = vpop.permute.xlu0 %332 }
  0xbb   : > { %v335_v9 = vsel %vm304_vm1, %v333_v7, 0.0  ;;  %v336_v10 = vsel %vm305_vm2, %v333_v7, 0.0 }
  0xbc   : > { %v337_v12 = vsel %vm244_vm0, %v335_v9, 0.0  ;;  %v344_v13 = vsel %vm244_vm0, %v336_v10, 0.0 }
  0xbd   : > { %v338_v14 = vrot.slane %v337_v12, 4  ;;  %v345_v15 = vrot.slane %v344_v13, 4 }
  0xbf   : > { %v339_v16 = vadd.f32 %v338_v14, %v337_v12  ;;  %v346_v17 = vadd.f32 %v345_v15, %v344_v13 }
  0xc1   : > { %v340_v20 = vrot.slane %v339_v16, 2  ;;  %v347_v21 = vrot.slane %v346_v17, 2 }
  0xc3   : > { %v341_v22 = vadd.f32 %v340_v20, %v339_v16  ;;  %v348_v23 = vadd.f32 %v347_v21, %v346_v17 }
  0xc5   : > { %v342_v26 = vrot.slane %v341_v22, 1  ;;  %v349_v27 = vrot.slane %v348_v23, 1 }
  0xc7   : > { %v343_v28 = vadd.f32 %v342_v26, %v341_v22  ;;  %v350_v29 = vadd.f32 %v349_v27, %v348_v23 }
  0xc9   : > { %v351_v32 = vmul.f32 %v343_v28, %v317_v3  ;;  %v352_v33 = vmul.f32 %v350_v29, %v324_v4 }
  0xcb   : > { %v359_v34 = vmul.f32 %v357_v30, %v351_v32  ;;  %v360_v35 = vmul.f32 %v358_v31, %v352_v33 }
  0xcd   : > { %v362_v36 = vsel %vm361_vm3, %v359_v34, 0.0  ;;  %v363_v37 = vsel %vm361_vm3, %v360_v35, 0.0 }
  0xce   : > { %v364_v38 = vadd.f32 %v363_v37, %v362_v36 }
  0xd0   : > { %365 = vadd.xlane.f32.xlu0 %v364_v38 }
 0x15d   : > { %v366_v40 = vpop.xlane.xlu0 %365 }
 0x15e   : > { %v367_v41 = vrot.slane %v366_v40, 4 }
 0x160   : > { %v368_v42 = vadd.f32 %v367_v41, %v366_v40 }
 0x162   : > { %v369_v43 = vrot.slane %v368_v42, 2 }
 0x164   : > { %v370_v44 = vadd.f32 %v369_v43, %v368_v42 }
 0x166   : > { %v371_v45 = vrot.slane %v370_v44, 1 }
 0x168   : > { %v372_v46 = vadd.f32 %v371_v45, %v370_v44 }
 0x16a   : > { %501 = vpush %v372_v46 }
 0x19b   : > { %s502_s29 = spop %501 }
 0x19c   : > { %v377_v48 = vstv %s502_s29 }
 0x19d   : > { %v378_v49 = vsel %vm376_vm4, %v377_v48, 0.0 }
 0x19e   : > { %379 = vst [vmem:[%s227_s23] sm:$0x1] %v378_v49 }
 0x19f   : > { %621 = shalt.err (!%p618_p4)
}
 0x1a0   : > { %s622_s5 = scalar_lea.hbm %s861_s7, 16  ;;  %s626_s10 = scalar_lea.hbm %s913_s3, 32 }
 0x1a1   : > { %p623_p10 = scmp.ne.s32.totalorder %s861_s7, %s622_s5  ;;  %p627_p2 = scmp.lt.u32.totalorder %s861_s7, %s913_s3 }
 0x1a2   : > { %p628_p5 = scmp.lt.u32.totalorder %s626_s10, %s622_s5  ;;  %p630_p9 = scmp.lt.u32.totalorder %s622_s5, %s861_s7 }
 0x1a3   : > { %p624_p12 = pnand %p623_p10, %p922_p11 }
 0x1a4   : > { %p629_p8 = por %p628_p5, %p627_p2 }
 0x1a5   : > { %p625_p1 = pneg %p624_p12 }
 0x1a6   : > { %p631_p0 = por %p630_p9, %p629_p8 }
 0x1a8   : > { %p632_p7 = pnand %p631_p0, %p625_p1 }
 0x1aa   : > { %635 = shalt.err (!%p632_p7)
}
 0x1ab   : > { %505 = dma.vmem_to_hbm [thread:$0]  (%p922_p11), %s863_s28, 16, %s861_s7, %s381_s11  }
 0x1ac PF: > { %s406_s22 = sand.u32 1, %s670_s12   ;;  %p923_p13 = scmp.ne.s32.totalorder %s918_s27, 0 }
 0x1ad   : > { %p924_p3 = scmp.ge.s32.totalorder %s690_s17, 2  ;;  %s407_s23 = scalar_lea.sflag [#allocation4], %s406_s22 }
 0x1af   : > { %p512_p6 = pnand %p924_p3, %p923_p13 }
 0x1b1   : > { %665 = dma.done.wait (!%p512_p6), %s407_s23, 16  }
 0x1b2   : > { %667 = vsyncadd (!%p512_p6), %s407_s23, 4294967280  ;;  %s19_s17 = sadd.s32 1, %s690_s17   ;;  %s925_s12 = smov %s674_s13 }
 0x1b3   : > { %p16_p4 = scmp.ge.s32.totalorder %s19_s17, 4   ;;  %s926_s13 = smov %s678_s14 }
 0x1b4   : > { %s927_s14 = smov %s771_s26  ;;  %s928_s15 = smov %s686_s16 }
 0x1b5   : > { %s929_s16 = smov %s931_s20  ;;  %18 = sbr.rel (!%p16_p4) target bundleno = 6 (0x6), region = 80 }
 0x1bc   :  { %411 = vsyncpa [#allocation3], 1 }
 0x1bd   :  { %413 = vsyncpa [#allocation3 + $0x1], 1 }
 0x1be   :  { %414 = vsyncpa [#allocation4], 1 }
 0x1bf   :  { %416 = vsyncpa [#allocation4 + $0x1], 1 }

</bundles_post_ra>
